<compile_context>
chip_gen: v7x
topology: tpu7x:2x2x1
jax: 0.10.0
libtpu: 0.0.40
codegen_flags: <defaults>
</compile_context>

<pallas_src>
import math

import jax
import jax.numpy as jnp
from jax.experimental import pallas as pl
from jax.experimental.pallas import tpu as pltpu


# ----------------------------- Pallas kernel --------------------------------
def _msp_kernel(x_ref, w_ref, b_ref, o_ref):
    """x_ref: (nB, Kp, Lt) bf16   w_ref: (nB, Cout, Kp) bf16
       b_ref: (nB, Cout, 1) f32   o_ref: (Cout, Lt)"""
    nB = x_ref.shape[0]
    inv_n = jnp.float32(1.0 / nB)
    acc = jnp.zeros(o_ref.shape, jnp.float32)
    for ni in range(nB):                      # static unroll, nB is tiny (<=3)
        z = jnp.dot(w_ref[ni], x_ref[ni],
                    preferred_element_type=jnp.float32)    # MXU, lane-dense
        z = z + b_ref[ni]                     # (Cout,1) lane-broadcast add
        acc = acc + z * jax.nn.sigmoid(z)     # SiLU (EUP sigmoid + VPU mul)
    o_ref[...] = (acc * inv_n).astype(o_ref.dtype)


# ------------------------------- wrapper -------------------------------------
def _round_up(x, m):
    return (x + m - 1) // m * m


def _extract_taps(x, k, stride, dilation):
    """im2col-lite: (B, Cin, H, W) -> (B, k*k*Cin, Hout*Wout), K order (kh,kw,cin)."""
    B, Cin, H, W = x.shape
    pad = math.ceil(((k - 1) * dilation + 1 - stride) / 2)
    Hp, Wp = H + 2 * pad, W + 2 * pad
    Hout = (Hp - dilation * (k - 1) - 1) // stride + 1
    Wout = (Wp - dilation * (k - 1) - 1) // stride + 1
    xp = jnp.pad(x, ((0, 0), (0, 0), (pad, pad), (pad, pad)))
    taps = []
    for kh in range(k):
        for kw in range(k):
            h0, w0 = kh * dilation, kw * dilation
            taps.append(xp[:, :,
                           h0:h0 + (Hout - 1) * stride + 1:stride,
                           w0:w0 + (Wout - 1) * stride + 1:stride])
    t = jnp.stack(taps, axis=1)                    # (B, k*k, Cin, Hout, Wout)
    return t.reshape(B, k * k * Cin, Hout * Wout), (Hout, Wout)


def _dense_grouped_weight(w, Cin, groups):
    """(Cout, Cin//g, k, k) -> dense (Cout, k*k*Cin), block-diagonal over
    groups, K ordered (kh, kw, cin) to match _extract_taps. Vectorised (no
    per-output-channel scatter loop)."""
    Cout, Cin_g, k, _ = w.shape
    cout_g = Cout // groups
    gidx = jnp.arange(Cout) // cout_g                        # (Cout,)
    onehot = jax.nn.one_hot(gidx, groups, dtype=w.dtype)     # (Cout, groups)
    w_t = jnp.transpose(w, (0, 2, 3, 1))                     # (Cout, k, k, Cin_g)
    dense = jnp.einsum("og,oabc->oabgc", onehot, w_t)        # (Cout,k,k,g,Cin_g)
    return dense.reshape(Cout, k * k * Cin)


def _choose_lane_tile(total_lanes, nB, Kp, Cout, *,
                      in_bytes=2, out_bytes=4, resident_bytes=0,
                      budget=12 * 1024 * 1024):
    """Lane tile (multiple of 128) so double-buffered tiles fit the VMEM budget."""
    lanes128 = max(1, pl.cdiv(total_lanes, 128))
    per128 = 2 * (nB * Kp * 128 * in_bytes + Cout * 128 * out_bytes)  # 2x: dbl-buf
    avail = max(per128, budget - resident_bytes)
    t128 = max(1, min(lanes128, avail // per128, 16))        # cap at 2048 lanes
    if lanes128 > 1:                    # guarantee >=2 grid steps (v7x: 2 TCs)
        t128 = min(t128, (lanes128 + 1) // 2)
    return int(t128) * 128


def ms_patch_emb(x, conv_ws, conv_bs, bn_ws, bn_bs, bn_means, bn_vars, *,
                 kernel_size=2, stride=2, dilations=(1, 2, 3), groups=1,
                 eps=1e-6):
    """x: (B, Cin, H, W)  -> (B, Cout, Hout, Wout).  Eval-mode BN folded."""
    B, Cin, H, W = x.shape
    Cout = conv_ws[0].shape[0]
    assert Cin % groups == 0 and Cout % groups == 0
    k, nB = kernel_size, len(dilations)
    K = k * k * Cin
    Kp = _round_up(K, 8)                          # sublane-aligned K

    # Per-branch taps; batch is folded into the last (lane) axis: X[i, :, b*L+l]
    xs, out_hw = [], None
    for d in dilations:
        t, hw = _extract_taps(x, k, stride, d)
        if out_hw is None:
            out_hw = hw
        elif hw != out_hw:
            raise ValueError("dilation branches produce mismatched output sizes")
        xs.append(jnp.transpose(t, (1, 0, 2)).reshape(K, -1))      # (K, B*L)
    Hout, Wout = out_hw
    L = Hout * Wout
    BL = B * L

    # Fold eval-mode BN into the conv: scale into W rows, mean/bias additive.
    Ws, Bs = [], []
    for i in range(nB):
        Wd = _dense_grouped_weight(conv_ws[i].astype(jnp.float32), Cin, groups)
        scale = bn_ws[i] / jnp.sqrt(bn_vars[i] + eps)              # (Cout,)
        Ws.append(Wd * scale[:, None])
        Bs.append(((conv_bs[i] - bn_means[i]) * scale + bn_bs[i])[:, None])
    Wall = jnp.stack(Ws, axis=0)                                   # (nB, Cout, K)
    Ball = jnp.stack(Bs, axis=0).astype(jnp.float32)               # (nB, Cout, 1)
    Wall = jnp.pad(Wall, ((0, 0), (0, 0), (0, Kp - K))).astype(jnp.bfloat16)

    # Lane-tile selection + padding of the lane axis to a multiple of the tile.
    resident = Wall.size * 2 + Ball.size * 4
    Lt = _choose_lane_tile(BL, nB, Kp, Cout, resident_bytes=resident)
    Lpad = _round_up(BL, Lt)

    X = jnp.stack(xs, axis=0)                                      # (nB, K, BL)
    X = jnp.pad(X, ((0, 0), (0, Kp - K), (0, Lpad - BL))).astype(jnp.bfloat16)

    out = pl.pallas_call(
        _msp_kernel,
        out_shape=jax.ShapeDtypeStruct((Cout, Lpad), x.dtype),
        grid_spec=pltpu.PrefetchScalarGridSpec(
            num_scalar_prefetch=0,
            grid=(Lpad // Lt,),
            in_specs=[
                pl.BlockSpec((nB, Kp, Lt), lambda j: (0, 0, j)),    # tap tile
                pl.BlockSpec((nB, Cout, Kp), lambda j: (0, 0, 0)),  # W (resident)
                pl.BlockSpec((nB, Cout, 1), lambda j: (0, 0, 0)),   # folded bias
            ],
            out_specs=pl.BlockSpec((Cout, Lt), lambda j: (0, j)),
        ),
        compiler_params=pltpu.CompilerParams(
            dimension_semantics=("parallel",),
            vmem_limit_bytes=32 * 1024 * 1024,
        ),
    )(X, Wall, Ball)

    out = out[:, :BL].reshape(Cout, B, Hout, Wout)
    return jnp.transpose(out, (1, 0, 2, 3))


# --------------------------- pure-JAX reference ------------------------------
def ms_patch_emb_ref(x, conv_ws, conv_bs, bn_ws, bn_bs, bn_means, bn_vars, *,
                     kernel_size, stride, dilations, groups, eps=1e-6):
    outs = []
    for i, d in enumerate(dilations):
        pad = math.ceil(((kernel_size - 1) * d + 1 - stride) / 2)
        z = jax.lax.conv_general_dilated(
            x, conv_ws[i], window_strides=(stride, stride),
            padding=[(pad, pad), (pad, pad)], rhs_dilation=(d, d),
            dimension_numbers=("NCHW", "OIHW", "NCHW"),
            feature_group_count=groups)
        z = z + conv_bs[i][None, :, None, None]
        z = (z - bn_means[i][None, :, None, None]) * (
            bn_ws[i][None, :, None, None]
            / jnp.sqrt(bn_vars[i][None, :, None, None] + eps)
        ) + bn_bs[i][None, :, None, None]
        z = z * jax.nn.sigmoid(z)        # SiLU
        outs.append(z)
    return jnp.mean(jnp.stack(outs, axis=-1), axis=-1)


# --------------------------------- demo ---------------------------------------
if __name__ == "__main__":
    B, Cin, H, W = 2, 4, 16, 16
    emb_dim = 8
    kernel_size, stride = 2, 2
    dilations = (1, 2, 3)
    groups = math.gcd(Cin, emb_dim)   # MSPatchEmb: c_group=-1 -> gcd(dim_in, emb_dim)

    key = jax.random.PRNGKey(0)
    keys = jax.random.split(key, 1 + 6 * len(dilations))
    x = jax.random.normal(keys[0], (B, Cin, H, W), dtype=jnp.float32)

    conv_ws, conv_bs, bn_ws, bn_bs, bn_means, bn_vars = [], [], [], [], [], []
    for i in range(len(dilations)):
        kk = keys[1 + 6 * i: 1 + 6 * (i + 1)]
        conv_ws.append(0.1 * jax.random.normal(
            kk[0], (emb_dim, Cin // groups, kernel_size, kernel_size), jnp.float32))
        conv_bs.append(0.1 * jax.random.normal(kk[1], (emb_dim,), jnp.float32))
        bn_ws.append(1.0 + 0.1 * jax.random.normal(kk[2], (emb_dim,), jnp.float32))
        bn_bs.append(0.1 * jax.random.normal(kk[3], (emb_dim,), jnp.float32))
        bn_means.append(0.1 * jax.random.normal(kk[4], (emb_dim,), jnp.float32))
        bn_vars.append(jnp.abs(jax.random.normal(kk[5], (emb_dim,), jnp.float32)) + 0.5)

    y = ms_patch_emb(x, conv_ws, conv_bs, bn_ws, bn_bs, bn_means, bn_vars,
                     kernel_size=kernel_size, stride=stride,
                     dilations=dilations, groups=groups)
    jax.block_until_ready(y)

    y_ref = ms_patch_emb_ref(x, conv_ws, conv_bs, bn_ws, bn_bs, bn_means, bn_vars,
                             kernel_size=kernel_size, stride=stride,
                             dilations=dilations, groups=groups)
    assert y.shape == y_ref.shape, (y.shape, y_ref.shape)
    # bf16 taps/weights with f32 accumulation -> looser tolerance than pure f32.
    assert jnp.allclose(y, y_ref, atol=2e-2, rtol=2e-2), float(
        jnp.max(jnp.abs(y - y_ref)))

    print("KERNEL_OK")
</pallas_src>

<mosaic_0001>
module attributes {stable_mosaic.version = 11 : i64} {
  func.func @_msp_kernel(%arg0: i32, %arg1: memref<3x16x128xbf16, #tpu.memory_space<vmem>>, %arg2: memref<3x8x16xbf16, #tpu.memory_space<vmem>>, %arg3: memref<3x8x1xf32, #tpu.memory_space<vmem>>, %arg4: memref<8x128xf32, #tpu.memory_space<vmem>>) attributes {dimension_semantics = [#tpu.dimension_semantics<parallel>], iteration_bounds = array<i64: 1>, scalar_prefetch = 0 : i64, scratch_operands = 0 : i64, tpu.core_type = #tpu.core_type<tc>, window_params = [{transform_indices = @transform_0, window_bounds = array<i64: 3, 16, 128>}, {pipeline_mode = #tpu.pipeline_mode<synchronous>, transform_indices = @transform_1, window_bounds = array<i64: 3, 8, 16>}, {pipeline_mode = #tpu.pipeline_mode<synchronous>, transform_indices = @transform_2, window_bounds = array<i64: 3, 8, 1>}, {transform_indices = @transform_3, window_bounds = array<i64: 8, 128>}]} {
    %cst = arith.constant 0.000000e+00 : f32
    %0 = vector.broadcast %cst : f32 to vector<8x128xf32>
    %c0 = arith.constant 0 : index
    %c0_0 = arith.constant 0 : index
    %c0_1 = arith.constant 0 : index
    %1 = vector.load %arg2[%c0, %c0_0, %c0_1] : memref<3x8x16xbf16, #tpu.memory_space<vmem>>, vector<1x8x16xbf16>
    %2 = vector.shape_cast %1 : vector<1x8x16xbf16> to vector<8x16xbf16>
    %c0_2 = arith.constant 0 : index
    %c0_3 = arith.constant 0 : index
    %c0_4 = arith.constant 0 : index
    %3 = vector.load %arg1[%c0_2, %c0_3, %c0_4] : memref<3x16x128xbf16, #tpu.memory_space<vmem>>, vector<1x16x128xbf16>
    %4 = vector.shape_cast %3 : vector<1x16x128xbf16> to vector<16x128xbf16>
    %cst_5 = arith.constant dense<0.000000e+00> : vector<8x128xf32>
    %5 = tpu.matmul %2, %4, %cst_5 {dimension_numbers = #tpu.dot_dimension_numbers<[1], [0], [0], [1], [0, 0, 1, 1], [], []>} : vector<8x16xbf16>, vector<16x128xbf16>, vector<8x128xf32> -> vector<8x128xf32>
    %c0_6 = arith.constant 0 : index
    %c0_7 = arith.constant 0 : index
    %c0_8 = arith.constant 0 : index
    %6 = vector.load %arg3[%c0_6, %c0_7, %c0_8] : memref<3x8x1xf32, #tpu.memory_space<vmem>>, vector<1x8x1xf32>
    %7 = vector.shape_cast %6 : vector<1x8x1xf32> to vector<8x1xf32>
    %8 = vector.broadcast %7 : vector<8x1xf32> to vector<8x128xf32>
    %9 = arith.addf %5, %8 : vector<8x128xf32>
    %10 = arith.negf %9 : vector<8x128xf32>
    %11 = math.exp %10 : vector<8x128xf32>
    %cst_9 = arith.constant 1.000000e+00 : f32
    %12 = vector.broadcast %cst_9 : f32 to vector<8x128xf32>
    %13 = arith.addf %12, %11 : vector<8x128xf32>
    %14 = arith.divf %12, %13 : vector<8x128xf32>
    %15 = arith.mulf %9, %14 : vector<8x128xf32>
    %16 = arith.addf %0, %15 : vector<8x128xf32>
    %c1 = arith.constant 1 : index
    %c0_10 = arith.constant 0 : index
    %c0_11 = arith.constant 0 : index
    %17 = vector.load %arg2[%c1, %c0_10, %c0_11] : memref<3x8x16xbf16, #tpu.memory_space<vmem>>, vector<1x8x16xbf16>
    %18 = vector.shape_cast %17 : vector<1x8x16xbf16> to vector<8x16xbf16>
    %c1_12 = arith.constant 1 : index
    %c0_13 = arith.constant 0 : index
    %c0_14 = arith.constant 0 : index
    %19 = vector.load %arg1[%c1_12, %c0_13, %c0_14] : memref<3x16x128xbf16, #tpu.memory_space<vmem>>, vector<1x16x128xbf16>
    %20 = vector.shape_cast %19 : vector<1x16x128xbf16> to vector<16x128xbf16>
    %cst_15 = arith.constant dense<0.000000e+00> : vector<8x128xf32>
    %21 = tpu.matmul %18, %20, %cst_15 {dimension_numbers = #tpu.dot_dimension_numbers<[1], [0], [0], [1], [0, 0, 1, 1], [], []>} : vector<8x16xbf16>, vector<16x128xbf16>, vector<8x128xf32> -> vector<8x128xf32>
    %c1_16 = arith.constant 1 : index
    %c0_17 = arith.constant 0 : index
    %c0_18 = arith.constant 0 : index
    %22 = vector.load %arg3[%c1_16, %c0_17, %c0_18] : memref<3x8x1xf32, #tpu.memory_space<vmem>>, vector<1x8x1xf32>
    %23 = vector.shape_cast %22 : vector<1x8x1xf32> to vector<8x1xf32>
    %24 = vector.broadcast %23 : vector<8x1xf32> to vector<8x128xf32>
    %25 = arith.addf %21, %24 : vector<8x128xf32>
    %26 = arith.negf %25 : vector<8x128xf32>
    %27 = math.exp %26 : vector<8x128xf32>
    %cst_19 = arith.constant 1.000000e+00 : f32
    %28 = vector.broadcast %cst_19 : f32 to vector<8x128xf32>
    %29 = arith.addf %28, %27 : vector<8x128xf32>
    %30 = arith.divf %28, %29 : vector<8x128xf32>
    %31 = arith.mulf %25, %30 : vector<8x128xf32>
    %32 = arith.addf %16, %31 : vector<8x128xf32>
    %c2 = arith.constant 2 : index
    %c0_20 = arith.constant 0 : index
    %c0_21 = arith.constant 0 : index
    %33 = vector.load %arg2[%c2, %c0_20, %c0_21] : memref<3x8x16xbf16, #tpu.memory_space<vmem>>, vector<1x8x16xbf16>
    %34 = vector.shape_cast %33 : vector<1x8x16xbf16> to vector<8x16xbf16>
    %c2_22 = arith.constant 2 : index
    %c0_23 = arith.constant 0 : index
    %c0_24 = arith.constant 0 : index
    %35 = vector.load %arg1[%c2_22, %c0_23, %c0_24] : memref<3x16x128xbf16, #tpu.memory_space<vmem>>, vector<1x16x128xbf16>
    %36 = vector.shape_cast %35 : vector<1x16x128xbf16> to vector<16x128xbf16>
    %cst_25 = arith.constant dense<0.000000e+00> : vector<8x128xf32>
    %37 = tpu.matmul %34, %36, %cst_25 {dimension_numbers = #tpu.dot_dimension_numbers<[1], [0], [0], [1], [0, 0, 1, 1], [], []>} : vector<8x16xbf16>, vector<16x128xbf16>, vector<8x128xf32> -> vector<8x128xf32>
    %c2_26 = arith.constant 2 : index
    %c0_27 = arith.constant 0 : index
    %c0_28 = arith.constant 0 : index
    %38 = vector.load %arg3[%c2_26, %c0_27, %c0_28] : memref<3x8x1xf32, #tpu.memory_space<vmem>>, vector<1x8x1xf32>
    %39 = vector.shape_cast %38 : vector<1x8x1xf32> to vector<8x1xf32>
    %40 = vector.broadcast %39 : vector<8x1xf32> to vector<8x128xf32>
    %41 = arith.addf %37, %40 : vector<8x128xf32>
    %42 = arith.negf %41 : vector<8x128xf32>
    %43 = math.exp %42 : vector<8x128xf32>
    %cst_29 = arith.constant 1.000000e+00 : f32
    %44 = vector.broadcast %cst_29 : f32 to vector<8x128xf32>
    %45 = arith.addf %44, %43 : vector<8x128xf32>
    %46 = arith.divf %44, %45 : vector<8x128xf32>
    %47 = arith.mulf %41, %46 : vector<8x128xf32>
    %48 = arith.addf %32, %47 : vector<8x128xf32>
    %cst_30 = arith.constant 0.333333343 : f32
    %49 = vector.broadcast %cst_30 : f32 to vector<8x128xf32>
    %50 = arith.mulf %48, %49 : vector<8x128xf32>
    %c0_31 = arith.constant 0 : index
    %c0_32 = arith.constant 0 : index
    %51 = vector.load %arg4[%c0_31, %c0_32] : memref<8x128xf32, #tpu.memory_space<vmem>>, vector<8x128xf32>
    tpu.vector_store %arg4[%c0_31, %c0_32], %50 {strides = array<i32>} : memref<8x128xf32, #tpu.memory_space<vmem>>, vector<8x128xf32>,
    return
  }
  func.func @transform_0(%arg0: i32) -> (i32, i32, i32) {
    %c0_i32 = arith.constant 0 : i32
    %c0_i32_0 = arith.constant 0 : i32
    %c0_i32_1 = arith.constant 0 : i32
    return %c0_i32, %c0_i32_0, %arg0 : i32, i32, i32
  }
  func.func @transform_1(%arg0: i32) -> (i32, i32, i32) {
    %c0_i32 = arith.constant 0 : i32
    %c0_i32_0 = arith.constant 0 : i32
    %c0_i32_1 = arith.constant 0 : i32
    %c0_i32_2 = arith.constant 0 : i32
    return %c0_i32, %c0_i32_0, %c0_i32_1 : i32, i32, i32
  }
  func.func @transform_2(%arg0: i32) -> (i32, i32, i32) {
    %c0_i32 = arith.constant 0 : i32
    %c0_i32_0 = arith.constant 0 : i32
    %c0_i32_1 = arith.constant 0 : i32
    %c0_i32_2 = arith.constant 0 : i32
    return %c0_i32, %c0_i32_0, %c0_i32_1 : i32, i32, i32
  }
  func.func @transform_3(%arg0: i32) -> (i32, i32) {
    %c0_i32 = arith.constant 0 : i32
    %c0_i32_0 = arith.constant 0 : i32
    return %c0_i32, %arg0 : i32, i32
  }
}

</mosaic_0001>

<bundles_post_ra>
// kernel: tpu_custom_call.1
= control target key start
LH: loop header
LB: loop body
LE: loop exit
PB: predicated region body
PF: predicated region fallthrough
CT: control target
= control target key end

     0   :  { %8 = vsyncpa [#allocation3], 0  ;;  %s438_s0 = inlined_call_operand.vmem [shape: bf16[3,16,128], index: 0, kind: input, shape index: {}]   ;;  %s439_s1 = inlined_call_operand.hbm [shape: bf16[3,8,16], index: 1, kind: input, shape index: {}]   ;;  %s440_s2 = inlined_call_operand.vmem [shape: f32[3,8,1], index: 2, kind: input, shape index: {}]   ;;  %s441_s3 = inlined_call_operand.hbm [shape: f32[8,128], index: 3, kind: output, shape index: {}]  }
   0x1   :  { %9 = vsyncpa [#allocation4], 0  ;;  %s363_s12 = smov [#allocation2]   ;;  %s315_s16 = scalar_lea.hbm %s439_s1, 192 }
   0x2   :  { %s17_s13 = sshll.u32 %s363_s12, 4  ;;  %p316_p0 = scmp.ne.s32.totalorder %s439_s1, %s315_s16  ;;  %s18_s13 = int_to_ptr.vmem [resolvable:$true] %s17_s13 }
   0x3   :  { %p319_p1 = scmp.lt.u32.totalorder %s315_s16, %s439_s1 }
   0x5   :  { %p321_p2 = pnand %p319_p1, %p316_p0 }
   0x7   :  { %324 = shalt.err (!%p321_p2)
}
   0x8   :  { %s325_s21 = scalar_lea.vmem %s18_s13, 192  ;;  %p330_p4 = scmp.lt.s32.totalorder %s18_s13, %s18_s13 }
   0x9   :  { %p326_p3 = scmp.ne.s32.totalorder %s18_s13, %s325_s21  ;;  %p331_p5 = scmp.lt.s32.totalorder %s325_s21, %s325_s21 }
   0xb   :  { %p332_p6 = por %p331_p5, %p330_p4 }
   0xd   :  { %p333_p7 = pnand %p332_p6, %p326_p3 }
   0xf   :  { %336 = shalt.err (!%p333_p7)
}
  0x10   :  { %s364_s22 = smov 64   ;;  %s365_s23 = smov 4  }
  0x11   :  { %23 = dma.hbm_to_vmem [thread:$0]  %s439_s1, 192, %s18_s13, [#allocation3], %s364_s22, %s364_s22, %s365_s23  }
  0x12   :  { %359 = dma.done.wait [#allocation3], 192  }
  0x13   :  { %360 = vsyncadd [#allocation3], 4294967104  ;;  %v366_v0 = vmov 0.0   ;;  %vm367_vm0 = vmmov 0   ;;  %v368_v1 = vmov 0   ;;  %v300_v2 = vld [vmem:[%s438_s0] sm:$0xff]  }
  0x14   :  { %273 = vmatprep.subr.bf16.mxu0 %v366_v0  ;;  %279 = vmatprep.subr.bf16.mxu1 %v366_v0  ;;  %v301_v3 = vld [vmem:[%s438_s0 + $0x8] sm:$0xff]   ;;  %v30_v4 = vld [vmem:[#allocation2] sm:$0xf]  ;;  %vm45_vm1 = vcmask 130048   ;;  %v98_v5 = vld [vmem:[#allocation2 + $0x4] sm:$0xf] }
  0x15   :  { %275 = vmatprep.mubr.msk.bf16.mxu0 %vm367_vm0, %v366_v0  ;;  %281 = vmatprep.mubr.msk.bf16.mxu1 %vm367_vm0, %v366_v0  ;;  %v302_v6 = vld [vmem:[%s438_s0 + $0x10] sm:$0xff]   ;;  %v33_v7 = vld [vmem:[%s440_s2] sm:$0xff]  ;;  %v257_v9 = vld [vmem:[%s440_s2 + $0x8] sm:$0xff]  ;;  %s369_s0 = smov [#allocation5]  }
  0x16   :  { %298 = vset.pattern.permute.xlu0 %v368_v1  ;;  %299 = vset.pattern.permute.xlu1 %v368_v1  ;;  %v263_v8 = vld [vmem:[%s440_s2 + $0x10] sm:$0xff]  ;;  %v167_v10 = vld [vmem:[#allocation2 + $0x8] sm:$0xf]  ;;  %s243_s2 = sshll.u32 %s369_s0, 4  ;;  %s244_s2 = int_to_ptr.vmem [resolvable:$true] %s243_s2 }
  0x17   :  { %274 = vmatpush3.bf16.msra.mxu0 %v300_v2  ;;  %280 = vmatpush3.bf16.msra.mxu1 %v301_v3  ;;  %s337_s10 = scalar_lea.vmem %s244_s2, 128  ;;  %p342_p9 = scmp.lt.s32.totalorder %s244_s2, %s244_s2 }
  0x18   :  { %285 = vmatprep.subr.bf16.mxu0 %v366_v0  ;;  %36 = vperm.xlu0 %298, %v33_v7   ;;  %p338_p8 = scmp.ne.s32.totalorder %s244_s2, %s337_s10  ;;  %p343_p10 = scmp.lt.s32.totalorder %s337_s10, %s337_s10 }
  0x19   :  { %175 = vperm.xlu1 %299, %v263_v8  }
  0x1a   :  { %276 = vmatmul.mubr.msk.bf16.vlgmr.msra.gmra.mrb[0].mxu0 %vm45_vm1, %v30_v4  ;;  %282 = vmatmul.mubr.msk.bf16.vlgmr.msra.gmra.mrb[0].mxu1 %vm45_vm1, %v98_v5  ;;  %p344_p11 = por %p343_p10, %p342_p9 }
  0x1b   :  { %286 = vmatpush3.bf16.msra.mxu0 %v302_v6  ;;  %287 = vmatprep.mubr.msk.bf16.mxu0 %vm367_vm0, %v366_v0 }
  0x1c   :  { %106 = vperm.xlu0 %298, %v257_v9   ;;  %p345_p12 = pnand %p344_p11, %p338_p8 }
  0x22   :  { %288 = vmatmul.mubr.msk.bf16.vlgmr.msra.gmra.mrb[4].mxu0 %vm45_vm1, %v167_v10 }
  0x97   :  { %v37_v11 = vpop.permute.xlu0 %36 }
  0x98   :  { %v176_v25 = vpop.permute.xlu1 %175 }
  0x9b   :  { %v107_v12 = vpop.permute.xlu0 %106 }
  0xed   :  { %v83_v13 = vpop.f32.mrb[0].mxu0  ;;  %v152_v14 = vpop.f32.mrb[0].mxu1 }
  0xee   :  { %v84_v15 = vadd.f32 %v83_v13, %v37_v11  ;;  %v277_v16 = vpop.f32.mrb[1].mxu0  ;;  %v153_v17 = vadd.f32 %v152_v14, %v107_v12  ;;  %v283_v19 = vpop.f32.mrb[1].mxu1 }
  0xef   :  { %v86_v18 = vpop.f32.mrb[2].mxu0  ;;  %v155_v22 = vpop.f32.mrb[2].mxu1 }
  0xf0   :  { %v254_v20 = vmul.f32 -1.442695, %v84_v15  ;;  %v278_v21 = vpop.f32.mrb[3].mxu0  ;;  %v260_v23 = vmul.f32 -1.442695, %v153_v17  ;;  %v284_v24 = vpop.f32.mrb[3].mxu1 }
  0xf2   :  { %303 = vpow2.f32 %v254_v20 }
  0xf3   :  { %305 = vpow2.f32 %v260_v23 }
  0xf5   :  { %v221_v26 = vpop.f32.mrb[4].mxu0 }
  0xf6   :  { %v222_v27 = vadd.f32 %v221_v26, %v176_v25  ;;  %v289_v28 = vpop.f32.mrb[5].mxu0 }
  0xf7   :  { %v224_v29 = vpop.f32.mrb[6].mxu0 }
  0xf8   :  { %v266_v30 = vmul.f32 -1.442695, %v222_v27  ;;  %v290_v31 = vpop.f32.mrb[7].mxu0 }
  0xfa   :  { %307 = vpow2.f32 %v266_v30 }
  0xfc   :  { %v304_v32 = vpop.eup %303 }
  0xfd   :  { %v306_v33 = vpop.eup %305  ;;  %v92_v34 = vadd.f32 1.0, %v304_v32 }
  0xfe   :  { %v161_v35 = vadd.f32 1.0, %v306_v33 }
  0xff   :  { %309 = vrcp.f32 %v92_v34 }
 0x100   :  { %311 = vrcp.f32 %v161_v35 }
 0x104   :  { %v308_v36 = vpop.eup %307 }
 0x105   :  { %v230_v37 = vadd.f32 1.0, %v308_v36 }
 0x107   :  { %313 = vrcp.f32 %v230_v37 }
 0x109   :  { %v310_v38 = vpop.eup %309 }
 0x10a   :  { %v312_v39 = vpop.eup %311  ;;  %v95_v40 = vmul.f32 %v310_v38, %v84_v15 }
 0x10b   :  { %v164_v41 = vmul.f32 %v312_v39, %v153_v17 }
 0x10d   :  { %v165_v42 = vadd.f32 %v164_v41, %v95_v40 }
 0x111   :  { %v314_v43 = vpop.eup %313 }
 0x112   :  { %v233_v44 = vmul.f32 %v314_v43, %v222_v27 }
 0x114   :  { %v234_v45 = vadd.f32 %v233_v44, %v165_v42 }
 0x116   :  { %v235_v46 = vmul.f32 0.33333334, %v234_v45 }
 0x118   :  { %236 = vst [vmem:[#allocation5] sm:$0xff] %v235_v46 }
 0x119   :  { %348 = shalt.err (!%p345_p12)
}
 0x11a   :  { %s349_s13 = scalar_lea.hbm %s441_s3, 128 }
 0x11b   :  { %p350_p13 = scmp.ne.s32.totalorder %s441_s3, %s349_s13  ;;  %p353_p0 = scmp.lt.u32.totalorder %s349_s13, %s441_s3 }
 0x11d   :  { %p355_p1 = pnand %p353_p0, %p350_p13 }
 0x11f   :  { %358 = shalt.err (!%p355_p1)
}
 0x120   :  { %246 = dma.vmem_to_hbm [thread:$0]  %s244_s2, 128, %s441_s3, [#allocation4]  }
 0x121   :  { %361 = dma.done.wait [#allocation4], 128  }
 0x122   :  { %362 = vsyncadd [#allocation4], 4294967168 }
 0x123   :  { %250 = vsyncpa [#allocation3], 1 }
 0x124   :  { %251 = vsyncpa [#allocation4], 1 }

</bundles_post_ra>
